<compile_context>
chip_gen: v7x
topology: tpu7x:2x2x1
jax: 0.10.0
libtpu: 0.0.40
codegen_flags: <defaults>
</compile_context>

<pallas_src>
import functools

import jax
import jax.numpy as jnp
from jax import lax
from jax.experimental import pallas as pl
from jax.experimental.pallas import tpu as pltpu

LANES = 128
TILE_BYTES = 4 * 1024 * 1024          # per-input bytes per grid step (dtype-independent)
VMEM_LIMIT_BYTES = 32 * 1024 * 1024   # explicit so v5e (16 MiB default) still compiles


def _sublane_multiple(dtype):
    # f32 -> 8, bf16 -> 16, int8/fp8 -> 32 (sub-32-bit dtypes pack along sublanes).
    return 8 * max(1, 4 // jnp.dtype(dtype).itemsize)


def _quantile_loss_kernel(x_ref, t_ref, out_ref, *, q, rows, tile_r, steps, needs_mask):
    k = pl.program_id(1)

    # Output block index is constant across k, so it stays resident in VMEM:
    # accumulate straight into it (no scratch buffer needed).
    @pl.when(k == 0)
    def _():
        out_ref[...] = jnp.zeros_like(out_ref)

    # Widen after load (inputs may be narrower than f32).
    d = x_ref[...].astype(jnp.float32) - t_ref[...].astype(jnp.float32)
    # Pinball loss: q*relu(d) + (1-q)*relu(-d) == max(q*d, (q-1)*d).
    loss = jnp.maximum(q * d, (q - 1.0) * d)

    if needs_mask:
        # Zero out rows past the end of the data: covers both the partial last
        # tile (rows % tile_r != 0) and the phantom step of an odd 2-core split.
        tile_idx = pl.program_id(0) * steps + k
        row_ids = tile_idx * tile_r + lax.broadcasted_iota(jnp.int32, loss.shape, 0)
        loss = jnp.where(row_ids < rows, loss, 0.0)

    # Fold the (tile_r, 128) tile into the vreg-shaped accumulator with pure
    # VPU adds; no cross-lane reduction inside the grid loop.
    acc_rows = out_ref.shape[0]
    if loss.shape[0] != acc_rows:
        loss = jnp.sum(loss.reshape(-1, acc_rows, LANES), axis=0)
    out_ref[...] += loss


def quantile_loss(x, target, q):
    """Pallas TPU implementation of QuantileLoss(q)(x, target)."""
    assert x.shape == target.shape, "x and target must have identical shapes"
    q = float(q)
    total = x.size

    xf = jnp.ravel(x)
    tf = jnp.ravel(target)

    def _plain_sum(xs, ts):
        d = xs.astype(jnp.float32) - ts.astype(jnp.float32)
        return jnp.sum(jnp.maximum(q * d, (q - 1.0) * d))

    rows = total // LANES
    if rows == 0:
        # Fewer than 128 elements: not worth a kernel launch.
        return _plain_sum(xf, tf) / total

    main = rows * LANES  # lane-aligned prefix handled by the kernel

    # Constant-byte row tiles: 4 MiB per input per step regardless of dtype,
    # aligned to the dtype's sublane packing.
    itemsize = max(jnp.dtype(x.dtype).itemsize, jnp.dtype(target.dtype).itemsize)
    sub = max(_sublane_multiple(x.dtype), _sublane_multiple(target.dtype))
    tile_r = min(TILE_BYTES // (LANES * itemsize), rows)
    if tile_r >= sub:
        tile_r -= tile_r % sub
    # else: tile_r == rows, i.e. the block spans the full (small) first dim.

    n_tiles = -(-rows // tile_r)

    # Unconditional 2-way split of the outer "parallel" axis (v7x megacore);
    # an odd tile count just adds one fully-masked phantom step.
    n_cores = 2 if n_tiles >= 2 else 1
    steps = -(-n_tiles // n_cores)

    acc_rows = 8 if tile_r % 8 == 0 else tile_r
    needs_mask = (n_cores * steps * tile_r) != rows

    if main == total:
        # Pure reshape of the contiguous buffer: no extra HBM copy.
        x2 = xf.reshape(rows, LANES)
        t2 = tf.reshape(rows, LANES)
    else:
        # TODO(synk): a <128-element lane tail forces this prefix slice (one
        # extra pass over the inputs); inherent to the lane-dense layout.
        x2 = xf[:main].reshape(rows, LANES)
        t2 = tf[:main].reshape(rows, LANES)

    kernel = functools.partial(
        _quantile_loss_kernel, q=q, rows=rows, tile_r=tile_r, steps=steps,
        needs_mask=needs_mask)

    last_tile = n_tiles - 1

    def in_map(p, k):
        # Clamp so the phantom step of an odd split re-reads a valid block;
        # its contribution is masked to zero in-kernel.
        return (jnp.minimum(p * steps + k, last_tile), 0)

    cost = pl.CostEstimate(
        flops=4 * main,
        transcendentals=0,
        bytes_accessed=(main * (jnp.dtype(x.dtype).itemsize
                                + jnp.dtype(target.dtype).itemsize)
                        + n_cores * acc_rows * LANES * 4),
    )

    partial_sums = pl.pallas_call(
        kernel,
        out_shape=jax.ShapeDtypeStruct((n_cores * acc_rows, LANES), jnp.float32),
        grid_spec=pltpu.PrefetchScalarGridSpec(
            num_scalar_prefetch=0,
            grid=(n_cores, steps),
            in_specs=[
                pl.BlockSpec((tile_r, LANES), in_map),
                pl.BlockSpec((tile_r, LANES), in_map),
            ],
            out_specs=pl.BlockSpec((acc_rows, LANES), lambda p, k: (p, 0)),
        ),
        compiler_params=pltpu.CompilerParams(
            dimension_semantics=("parallel", "arbitrary"),
            vmem_limit_bytes=VMEM_LIMIT_BYTES,
        ),
        cost_estimate=cost,
    )(x2, t2)

    # Single tiny cross-lane reduce over the lane-dense per-core partial sums.
    total_sum = jnp.sum(partial_sums)

    # Fold in the (<128-element) lane tail, if any, with plain JAX.
    if main < total:
        total_sum = total_sum + _plain_sum(xf[main:], tf[main:])

    return total_sum / total


if __name__ == "__main__":
    key = jax.random.PRNGKey(0)
    kx, kt = jax.random.split(key)

    # Small NCHW-shaped example inputs (QuantileLoss is shape-agnostic).
    x = jax.random.normal(kx, (2, 4, 16, 16), dtype=jnp.float32)
    target = jax.random.normal(kt, (2, 4, 16, 16), dtype=jnp.float32)
    q = 0.7  # quantile hyperparameter from __init__

    loss_fn = jax.jit(functools.partial(quantile_loss, q=q))
    loss = jax.block_until_ready(loss_fn(x, target))

    # Pure-JAX reference check (same semantics as the PyTorch forward).
    d = x - target
    ref = jnp.mean(q * jnp.maximum(d, 0.0) + (1.0 - q) * jnp.maximum(-d, 0.0))
    assert jnp.allclose(loss, ref, rtol=1e-5, atol=1e-6), (loss, ref)

    print("KERNEL_OK")
</pallas_src>

<mosaic_0001>
module attributes {stable_mosaic.version = 11 : i64} {
  func.func @_quantile_loss_kernel(%arg0: i32, %arg1: i32, %arg2: memref<16x128xf32, #tpu.memory_space<vmem>>, %arg3: memref<16x128xf32, #tpu.memory_space<vmem>>, %arg4: memref<8x128xf32, #tpu.memory_space<vmem>>) attributes {dimension_semantics = [#tpu.dimension_semantics<parallel>, #tpu.dimension_semantics<arbitrary>], iteration_bounds = array<i64: 1, 1>, scalar_prefetch = 0 : i64, scratch_operands = 0 : i64, tpu.core_type = #tpu.core_type<tc>, window_params = [{transform_indices = @transform_0, window_bounds = array<i64: 16, 128>}, {transform_indices = @transform_1, window_bounds = array<i64: 16, 128>}, {transform_indices = @transform_2, window_bounds = array<i64: 8, 128>}]} {
    %c0_i32 = arith.constant 0 : i32
    %0 = arith.cmpi eq, %arg1, %c0_i32 : i32
    %1 = arith.extui %0 : i1 to i32
    %c0_i32_0 = arith.constant 0 : i32
    %2 = arith.cmpi ne, %1, %c0_i32_0 : i32
    scf.if %2 {
      %cst_10 = arith.constant 0.000000e+00 : f32
      %16 = vector.broadcast %cst_10 : f32 to vector<8x128xf32>
      %c0_11 = arith.constant 0 : index
      %c0_12 = arith.constant 0 : index
      %17 = vector.load %arg4[%c0_11, %c0_12] : memref<8x128xf32, #tpu.memory_space<vmem>>, vector<8x128xf32>
      tpu.vector_store %arg4[%c0_11, %c0_12], %16 {strides = array<i32>} : memref<8x128xf32, #tpu.memory_space<vmem>>, vector<8x128xf32>,
    } else {
    }
    %c0 = arith.constant 0 : index
    %c0_1 = arith.constant 0 : index
    %3 = vector.load %arg2[%c0, %c0_1] : memref<16x128xf32, #tpu.memory_space<vmem>>, vector<16x128xf32>
    %c0_2 = arith.constant 0 : index
    %c0_3 = arith.constant 0 : index
    %4 = vector.load %arg3[%c0_2, %c0_3] : memref<16x128xf32, #tpu.memory_space<vmem>>, vector<16x128xf32>
    %5 = arith.subf %3, %4 : vector<16x128xf32>
    %cst = arith.constant 0.699999988 : f32
    %6 = vector.broadcast %cst : f32 to vector<16x128xf32>
    %7 = arith.mulf %6, %5 : vector<16x128xf32>
    %cst_4 = arith.constant -3.000000e-01 : f32
    %8 = vector.broadcast %cst_4 : f32 to vector<16x128xf32>
    %9 = arith.mulf %8, %5 : vector<16x128xf32>
    %10 = arith.maximumf %7, %9 : vector<16x128xf32>
    %11 = vector.shape_cast %10 : vector<16x128xf32> to vector<2x8x128xf32>
    %cst_5 = arith.constant dense<0.000000e+00> : vector<8x128xf32>
    %12 = vector.multi_reduction <add>, %11, %cst_5 [0] : vector<2x8x128xf32> to vector<8x128xf32>
    %c0_6 = arith.constant 0 : index
    %c0_7 = arith.constant 0 : index
    %13 = vector.load %arg4[%c0_6, %c0_7] : memref<8x128xf32, #tpu.memory_space<vmem>>, vector<8x128xf32>
    %14 = arith.addf %13, %12 : vector<8x128xf32>
    %c0_8 = arith.constant 0 : index
    %c0_9 = arith.constant 0 : index
    %15 = vector.load %arg4[%c0_8, %c0_9] : memref<8x128xf32, #tpu.memory_space<vmem>>, vector<8x128xf32>
    tpu.vector_store %arg4[%c0_8, %c0_9], %14 {strides = array<i32>} : memref<8x128xf32, #tpu.memory_space<vmem>>, vector<8x128xf32>,
    return
  }
  func.func @transform_0(%arg0: i32, %arg1: i32) -> (i32, i32) {
    %c1_i32 = arith.constant 1 : i32
    %0 = arith.muli %arg0, %c1_i32 : i32
    %1 = arith.addi %0, %arg1 : i32
    %c0_i32 = arith.constant 0 : i32
    %2 = arith.minsi %1, %c0_i32 : i32
    %c0_i32_0 = arith.constant 0 : i32
    %c0_i32_1 = arith.constant 0 : i32
    return %2, %c0_i32_0 : i32, i32
  }
  func.func @transform_1(%arg0: i32, %arg1: i32) -> (i32, i32) {
    %c1_i32 = arith.constant 1 : i32
    %0 = arith.muli %arg0, %c1_i32 : i32
    %1 = arith.addi %0, %arg1 : i32
    %c0_i32 = arith.constant 0 : i32
    %2 = arith.minsi %1, %c0_i32 : i32
    %c0_i32_0 = arith.constant 0 : i32
    %c0_i32_1 = arith.constant 0 : i32
    return %2, %c0_i32_0 : i32, i32
  }
  func.func @transform_2(%arg0: i32, %arg1: i32) -> (i32, i32) {
    %c0_i32 = arith.constant 0 : i32
    %c0_i32_0 = arith.constant 0 : i32
    return %arg0, %c0_i32 : i32, i32
  }
}

</mosaic_0001>

<bundles_post_ra>
// kernel: quantile_loss.1
= control target key start
LH: loop header
LB: loop body
LE: loop exit
PB: predicated region body
PF: predicated region fallthrough
CT: control target
= control target key end

     0   :  { %s143_s0 = inlined_call_operand.vmem [shape: f32[16,128], index: 0, kind: input, shape index: {}]   ;;  %s144_s1 = inlined_call_operand.vmem [shape: f32[16,128], index: 1, kind: input, shape index: {}]   ;;  %s145_s2 = inlined_call_operand.vmem [shape: f32[8,128], index: 2, kind: output, shape index: {}]  }
   0x1   :  { %v80_v0 = vld [vmem:[%s143_s0] sm:$0xff]  ;;  %v81_v1 = vld [vmem:[%s143_s0 + $0x8] sm:$0xff] }
   0x2   :  { %v82_v2 = vld [vmem:[%s144_s1] sm:$0xff]  ;;  %v83_v3 = vld [vmem:[%s144_s1 + $0x8] sm:$0xff] }
   0x3   :  { %v84_v4 = vsub.f32 %v80_v0, %v82_v2  ;;  %v85_v5 = vsub.f32 %v81_v1, %v83_v3 }
   0x5   :  { %v86_v6 = vmul.f32 0.7, %v84_v4  ;;  %v88_v7 = vmul.f32 -0.3, %v84_v4  ;;  %v87_v8 = vmul.f32 0.7, %v85_v5 }
   0x6   :  { %v89_v9 = vmul.f32 -0.3, %v85_v5 }
   0x7   :  { %v90_v10 = vmax.f32 %v86_v6, %v88_v7 }
   0x8   :  { %v91_v11 = vmax.f32 %v87_v8, %v89_v9 }
   0xa   :  { %v92_v12 = vadd.f32 %v91_v11, %v90_v10 }
   0xc   :  { %95 = vst [vmem:[%s145_s2] sm:$0xff] %v92_v12 }

</bundles_post_ra>
